<compile_context>
chip_gen: v7x
topology: tpu7x:2x2x1
jax: 0.10.0
libtpu: 0.0.40
codegen_flags: <defaults>
</compile_context>

<pallas_src>
import functools

import jax
import jax.numpy as jnp
import numpy as np
from jax.experimental import pallas as pl
from jax.experimental.pallas import tpu as pltpu

MASK_RATE = 0.5          # cfg.dataset.ogbn_arxiv.mask_rate
NUM_CLASSES = 40         # cfg.share.dim_out for ogbn-arxiv


def _round_up(n, m):
    return pl.cdiv(n, m) * m


def _padded_vmem_bytes(shape, dtype):
    """True VMEM footprint of one 2-D block: lane dim -> 128, sublane dim -> 8."""
    rows = _round_up(int(shape[-2]), 8)
    cols = _round_up(int(shape[-1]), 128)
    return rows * cols * jnp.dtype(dtype).itemsize


def _default_tile_n():
    """8192 rows on 128-MiB-VMEM chips (v5e/v6e), 4096 on 64-MiB chips (v7x)."""
    try:
        vmem = pltpu.get_tpu_info().vmem_capacity_bytes
    except Exception:
        vmem = 64 * 1024 * 1024  # conservative (v7x-sized) fallback
    return 8192 if vmem >= 100 * 1024 * 1024 else 4096


def _add_labels_kernel(x_ref, y_ref, xout_ref, *, num_classes):
    """Streams x into xout[:, :F] and writes a masked one-hot into xout[:, F:].

    y_ref holds pre-masked labels: a valid class id where train_labels_mask is
    True, -1 otherwise (the compare never matches -> all-zero one-hot row).
    Rows past N in the last partial block hold garbage; they only feed a copy
    and an int compare, and Pallas masks their writeback.
    """
    x = x_ref[...]                         # (TN, F)   f32
    ym = y_ref[...]                        # (TN, 1)   int32, -1 = "no label"
    tn, f = x.shape

    class_ids = jax.lax.broadcasted_iota(jnp.int32, (tn, num_classes), 1)
    onehot = (class_ids == ym).astype(x.dtype)

    # concat([x, onehot], dim=-1): 128-lane-aligned bulk store + narrow tail store.
    xout_ref[:, :f] = x
    xout_ref[:, f:] = onehot


def _add_labels_pallas(x, y_masked, *, num_classes, tile_n=None):
    """x: [N, F]; y_masked: [N, 1] int32 (-1 sentinel). Returns [N, F+num_classes]."""
    N, F = x.shape

    if tile_n is None:
        tile_n = _default_tile_n()
    # Never larger than the (8-row rounded) problem; keep the sublane rule satisfied.
    tile_n = int(min(int(tile_n), _round_up(N, 8)))
    tile_n = int(_round_up(tile_n, 8))
    num_tiles = int(pl.cdiv(N, tile_n))

    # Padding-aware VMEM accounting (double-buffered by the auto pipeline).
    block_bytes = (_padded_vmem_bytes((tile_n, F), x.dtype)
                   + _padded_vmem_bytes((tile_n, 1), jnp.int32)
                   + _padded_vmem_bytes((tile_n, F + num_classes), x.dtype))
    vmem_needed = 2 * block_bytes + (2 << 20)     # double-buffered + headroom
    vmem_limit = None
    if vmem_needed > 16 * 1024 * 1024:            # above v5e's default scoped VMEM
        vmem_limit = int(min(_round_up(vmem_needed, 1 << 20), 48 * 1024 * 1024))

    itemsize = jnp.dtype(x.dtype).itemsize
    bytes_accessed = N * (F * itemsize + 4 + (F + num_classes) * itemsize)
    cost = pl.CostEstimate(flops=N * num_classes, transcendentals=0,
                           bytes_accessed=int(bytes_accessed))

    kernel = functools.partial(_add_labels_kernel, num_classes=num_classes)

    return pl.pallas_call(
        kernel,
        out_shape=jax.ShapeDtypeStruct((N, F + num_classes), x.dtype),
        grid_spec=pltpu.PrefetchScalarGridSpec(
            num_scalar_prefetch=0,
            grid=(num_tiles,),
            in_specs=[
                pl.BlockSpec((tile_n, F), lambda i: (i, 0)),
                pl.BlockSpec((tile_n, 1), lambda i: (i, 0)),
            ],
            out_specs=pl.BlockSpec((tile_n, F + num_classes), lambda i: (i, 0)),
        ),
        compiler_params=pltpu.CompilerParams(
            dimension_semantics=("parallel",),
            vmem_limit_bytes=vmem_limit),
        cost_estimate=cost,
    )(x, y_masked)


def ogbn_arxiv_node_encoder(x, y, train_mask, rand=None, *,
                            mask_rate=MASK_RATE, num_classes=NUM_CLASSES,
                            use_labels=True, training=True, tile_n=None):
    """Forward of OGBNArxivNodeEncoder.

    x: [N, F] f32; y: [N, 1] int; train_mask: [N] bool/int;
    rand: [N] f32 uniform [0,1) (stand-in for torch.rand; required iff the
    training path with mask_rate is taken).

    Returns (batch_x, train_pred_mask). batch_x is [N, F+num_classes] when the
    label-augmentation branch is taken, otherwise x unchanged.
    """
    N, F = x.shape
    train_mask = train_mask.reshape(N).astype(bool)

    if mask_rate is not None and use_labels:
        if training:
            rnd = rand.reshape(N).astype(jnp.float32)
            mask = rnd < mask_rate
            labels_mask = train_mask & mask
            pred_mask = train_mask & jnp.logical_not(mask)
        else:
            labels_mask = train_mask
            pred_mask = train_mask
        # Pre-masked labels: -1 sentinel where the one-hot row must stay zero.
        y_masked = jnp.where(labels_mask, y.reshape(N).astype(jnp.int32),
                             jnp.int32(-1)).reshape(N, 1)
        x_out = _add_labels_pallas(x, y_masked, num_classes=num_classes,
                                   tile_n=tile_n)
        return x_out, pred_mask
    elif training and mask_rate is not None:
        # use_labels=False training branch: x untouched, mask-only pred mask.
        rnd = rand.reshape(N).astype(jnp.float32)
        pred_mask = train_mask & (rnd < mask_rate)
        return x, pred_mask
    else:
        return x, train_mask


def _reference(x, y, train_mask, rand, mask_rate, num_classes, training):
    train_mask = train_mask.astype(bool)
    if training and (mask_rate is not None):
        mask = rand < mask_rate
        labels_mask = train_mask & mask
        pred_mask = train_mask & (~mask)
    else:
        labels_mask = pred_mask = train_mask
    n = x.shape[0]
    onehot = jnp.zeros((n, num_classes), dtype=x.dtype)
    onehot = onehot.at[jnp.arange(n), y[:, 0]].set(
        jnp.where(labels_mask, 1.0, 0.0).astype(x.dtype))
    return jnp.concatenate([x, onehot], axis=-1), pred_mask


if __name__ == "__main__":
    key = jax.random.PRNGKey(0)
    # Small shapes; N deliberately NOT a multiple of the tile to exercise the
    # in-kernel ragged-last-tile path (real ogbn-arxiv has N = 169,343).
    N, F, C = 300, 128, NUM_CLASSES
    kx, ky, km, kr = jax.random.split(key, 4)

    x = jax.random.normal(kx, (N, F), dtype=jnp.float32)
    y = jax.random.randint(ky, (N, 1), 0, C, dtype=jnp.int32)
    train_mask = jax.random.uniform(km, (N,)) < 0.7            # bool [N]
    rand = jax.random.uniform(kr, (N,), dtype=jnp.float32)     # torch.rand stand-in

    # Training path (label masking + one-hot concat), small tile -> 3 blocks,
    # last one partial (rows 256..299 valid, 300..383 masked on writeback).
    x_out, pred_mask = ogbn_arxiv_node_encoder(
        x, y, train_mask, rand, training=True, tile_n=128)
    jax.block_until_ready((x_out, pred_mask))

    x_ref, pred_ref = _reference(x, y, train_mask, rand, MASK_RATE, C, True)
    assert x_out.shape == (N, F + C)
    np.testing.assert_allclose(np.asarray(x_out), np.asarray(x_ref), atol=0, rtol=0)
    np.testing.assert_array_equal(np.asarray(pred_mask), np.asarray(pred_ref))

    # Eval path (no rand needed; auto tile_n, single partial block).
    x_out_e, pred_e = ogbn_arxiv_node_encoder(
        x, y, train_mask, None, training=False, tile_n=None)
    jax.block_until_ready((x_out_e, pred_e))
    x_ref_e, pred_ref_e = _reference(x, y, train_mask, rand, MASK_RATE, C, False)
    np.testing.assert_allclose(np.asarray(x_out_e), np.asarray(x_ref_e),
                               atol=0, rtol=0)
    np.testing.assert_array_equal(np.asarray(pred_e), np.asarray(pred_ref_e))

    print("KERNEL_OK")
</pallas_src>

<mosaic_0001>
module attributes {stable_mosaic.version = 11 : i64} {
  func.func @_add_labels_kernel(%arg0: i32, %arg1: memref<128x128xf32, #tpu.memory_space<vmem>>, %arg2: memref<128x1xi32, #tpu.memory_space<vmem>>, %arg3: memref<128x168xf32, #tpu.memory_space<vmem>>) attributes {dimension_semantics = [#tpu.dimension_semantics<parallel>], iteration_bounds = array<i64: 3>, scalar_prefetch = 0 : i64, scratch_operands = 0 : i64, tpu.core_type = #tpu.core_type<tc>, window_params = [{transform_indices = @transform_0, window_bounds = array<i64: 128, 128>}, {transform_indices = @transform_1, window_bounds = array<i64: 128, 1>}, {transform_indices = @transform_2, window_bounds = array<i64: 128, 168>}]} {
    %c0 = arith.constant 0 : index
    %c0_0 = arith.constant 0 : index
    %0 = vector.load %arg1[%c0, %c0_0] : memref<128x128xf32, #tpu.memory_space<vmem>>, vector<128x128xf32>
    %c0_1 = arith.constant 0 : index
    %c0_2 = arith.constant 0 : index
    %1 = vector.load %arg2[%c0_1, %c0_2] : memref<128x1xi32, #tpu.memory_space<vmem>>, vector<128x1xi32>
    %2 = tpu.iota {dimensions = array<i32: 1>} : vector<128x40xi32>
    %3 = vector.broadcast %1 : vector<128x1xi32> to vector<128x40xi32>
    %4 = arith.cmpi eq, %2, %3 : vector<128x40xi32>
    %5 = arith.extui %4 : vector<128x40xi1> to vector<128x40xi32>
    %6 = arith.sitofp %5 : vector<128x40xi32> to vector<128x40xf32>
    %c0_3 = arith.constant 0 : index
    %c0_4 = arith.constant 0 : index
    %7 = vector.load %arg3[%c0_3, %c0_4] : memref<128x168xf32, #tpu.memory_space<vmem>>, vector<128x128xf32>
    tpu.vector_store %arg3[%c0_3, %c0_4], %0 {strides = array<i32>} : memref<128x168xf32, #tpu.memory_space<vmem>>, vector<128x128xf32>,
    %c0_5 = arith.constant 0 : index
    %c128 = arith.constant 128 : index
    %8 = vector.load %arg3[%c0_5, %c128] : memref<128x168xf32, #tpu.memory_space<vmem>>, vector<128x40xf32>
    tpu.vector_store %arg3[%c0_5, %c128], %6 {strides = array<i32>} : memref<128x168xf32, #tpu.memory_space<vmem>>, vector<128x40xf32>,
    return
  }
  func.func @transform_0(%arg0: i32) -> (i32, i32) {
    %c0_i32 = arith.constant 0 : i32
    %c0_i32_0 = arith.constant 0 : i32
    return %arg0, %c0_i32 : i32, i32
  }
  func.func @transform_1(%arg0: i32) -> (i32, i32) {
    %c0_i32 = arith.constant 0 : i32
    %c0_i32_0 = arith.constant 0 : i32
    return %arg0, %c0_i32 : i32, i32
  }
  func.func @transform_2(%arg0: i32) -> (i32, i32) {
    %c0_i32 = arith.constant 0 : i32
    %c0_i32_0 = arith.constant 0 : i32
    return %arg0, %c0_i32 : i32, i32
  }
}

</mosaic_0001>

<bundles_post_ra>
// kernel: tpu_custom_call.1
= control target key start
LH: loop header
LB: loop body
LE: loop exit
PB: predicated region body
PF: predicated region fallthrough
CT: control target
= control target key end

     0   :  { %s849_s9 = smov 0   ;;  %s851_s10 = smov 0   ;;  %s1115_s0 = inlined_call_operand.vmem [shape: f32[300,128], index: 0, kind: input, shape index: {}]   ;;  %s1116_s1 = inlined_call_operand.vmem [shape: s32[300,1], index: 1, kind: input, shape index: {}]   ;;  %s1117_s2 = inlined_call_operand.vmem [shape: f32[300,168], index: 2, kind: output, shape index: {}]  }
   0x1   :  { %s853_s11 = smov 0  }
   0x2 LB: > { %s860_s12 = sadd.s32 4294967295, %s798_s11   ;;  %s862_s13 = sadd.s32 1, %s798_s11   ;;  %s798_s11 = sphi %s853_s11, %s1126_s11   ;;  %s794_s10 = sphi %s851_s10, %s1125_s10   ;;  %s790_s9 = sphi %s849_s9, %s1124_s9  }
   0x3   : > { %s68_s14 = ssub.s32 %s798_s11, %s862_s13  ;;  %s71_s15 = sadd.s32 1, %s794_s10 }
   0x4   : > { %p69_p0 = scmp.eq.s32.totalorder %s68_s14, 0  ;;  %p81_p1 = scmp.ne.s32.totalorder %s794_s10, %s790_s9 }
   0x5   : > { %p82_p2 = scmp.eq.s32.totalorder %s860_s12, 2  ;;  %p606_p3 = scmp.ge.s32.totalorder %s798_s11, 1 }
   0x6   : > { %s869_s16 = scalar_select %p69_p0, %s794_s10, %s71_s15  }
   0x7   : > { %p871_p4 = por %p82_p2, %p81_p1  ;;  %p140_p5 = scmp.lt.s32.totalorder %s798_s11, 4 }
   0x9   : > { %p141_p6 = pnand %p606_p3, %p140_p5 }
   0xa   : > { %s876_s18 = sshll.u32 (!%p141_p6), %s860_s12, 4  ;;  %v832_v0 = vmov (!%p141_p6), 0   ;;  %s171_s19 = sand.u32 (!%p141_p6), 1, %s790_s9   ;;  %v240_v33 = vlaneseq (!%p141_p6)  ;;  %vm354_vm0 = vcmask (!%p141_p6), 326656   ;;  %v833_v36 = vmov (!%p141_p6), 0.0  }
   0xb   : > { %144 = sbr.rel (%p141_p6) target bundleno = 245 (0xf5), region = 28  ;;  %743 = vset.pattern.permute.xlu1 (!%p141_p6), %v832_v0  ;;  %742 = vset.pattern.permute.xlu0 (!%p141_p6), %v832_v0  ;;  %p179_p7 = scmp.lt.s32.totalorder (!%p141_p6), %s876_s18, 37 }
   0xc   : > { %s607_s21 = sshll.u32 (!%p141_p6), %s171_s19, 8  ;;  %v922_v34 = vand.u32 (!%p141_p6), 127, %v240_v33 }
   0xd   : > { %s889_s29 = scalar_lea.vmem (!%p141_p6), [#allocation2], %s607_s21  }
  0x12   : > { %s180_s20 = scalar_select %p179_p7, %s876_s18, 37 }
  0x13   : > { %s379_s30 = ssub.s32 (%p871_p4), 38, %s876_s18  ;;  %s649_s3 = sshll.u32 (%p871_p4), %s860_s12, 8 }
  0x14   : > { %s609_s22 = sshll.u32 %s180_s20, 3  ;;  %p380_p8 = scmp.lt.s32.totalorder (%p871_p4), %s379_s30, 16 }
  0x15   : > { %s883_s25 = scalar_lea.vmem %s1116_s1, %s609_s22  ;;  %s182_s28 = scalar_lea.vmem %s1115_s0, %s609_s22 }
  0x16   : > { %v226_v1 = vld [vmem:[%s883_s25 + $0x10] sm:$0xff]  ;;  %v208_v2 = vld [vmem:[%s182_s28] sm:$0xff]  ;;  %v209_v3 = vld [vmem:[%s182_s28 + $0x8] sm:$0xff]  ;;  %s979_s6 = scalar_lea.vmem (%p871_p4), %s1117_s2, %s649_s3  }
  0x17   : > { %249 = vperm.xlu1 %743, %v226_v1   ;;  %v210_v4 = vld [vmem:[%s182_s28 + $0x10] sm:$0xff]  ;;  %v211_v5 = vld [vmem:[%s182_s28 + $0x18] sm:$0xff]  ;;  %v212_v6 = vld [vmem:[%s182_s28 + $0x20] sm:$0xff]  ;;  %338 = vst [vmem:[%s889_s29] sm:$0xff] %v208_v2 }
  0x18   : > { %339 = vst [vmem:[%s889_s29 + $0x10] sm:$0xff] %v209_v3  ;;  %v213_v7 = vld [vmem:[%s182_s28 + $0x28] sm:$0xff]  ;;  %v214_v8 = vld [vmem:[%s182_s28 + $0x30] sm:$0xff]  ;;  %v215_v9 = vld [vmem:[%s182_s28 + $0x38] sm:$0xff] }
  0x19   : > { %340 = vst [vmem:[%s889_s29 + $0x20] sm:$0xff] %v210_v4  ;;  %341 = vst [vmem:[%s889_s29 + $0x30] sm:$0xff] %v211_v5  ;;  %v216_v10 = vld [vmem:[%s182_s28 + $0x40] sm:$0xff]  ;;  %v217_v11 = vld [vmem:[%s182_s28 + $0x48] sm:$0xff] }
  0x1a   : > { %342 = vst [vmem:[%s889_s29 + $0x40] sm:$0xff] %v212_v6  ;;  %v218_v12 = vld [vmem:[%s182_s28 + $0x50] sm:$0xff]  ;;  %343 = vst [vmem:[%s889_s29 + $0x50] sm:$0xff] %v213_v7  ;;  %v219_v13 = vld [vmem:[%s182_s28 + $0x58] sm:$0xff] }
  0x1b   : > { %344 = vst [vmem:[%s889_s29 + $0x60] sm:$0xff] %v214_v8  ;;  %345 = vst [vmem:[%s889_s29 + $0x70] sm:$0xff] %v215_v9  ;;  %v220_v14 = vld [vmem:[%s182_s28 + $0x60] sm:$0xff]  ;;  %v221_v15 = vld [vmem:[%s182_s28 + $0x68] sm:$0xff] }
  0x1c   : > { %346 = vst [vmem:[%s889_s29 + $0x80] sm:$0xff] %v216_v10  ;;  %347 = vst [vmem:[%s889_s29 + $0x90] sm:$0xff] %v217_v11  ;;  %v222_v16 = vld [vmem:[%s182_s28 + $0x70] sm:$0xff]  ;;  %v223_v17 = vld [vmem:[%s182_s28 + $0x78] sm:$0xff] }
  0x1d   : > { %348 = vst [vmem:[%s889_s29 + $0xa0] sm:$0xff] %v218_v12  ;;  %349 = vst [vmem:[%s889_s29 + $0xb0] sm:$0xff] %v219_v13  ;;  %v224_v18 = vld [vmem:[%s883_s25] sm:$0xff]  ;;  %v227_v19 = vld [vmem:[%s883_s25 + $0x18] sm:$0xff] }
  0x1e   : > { %350 = vst [vmem:[%s889_s29 + $0xc0] sm:$0xff] %v220_v14  ;;  %351 = vst [vmem:[%s889_s29 + $0xd0] sm:$0xff] %v221_v15  ;;  %243 = vperm.xlu0 %742, %v224_v18   ;;  %252 = vperm.xlu1 %743, %v227_v19   ;;  %v225_v20 = vld [vmem:[%s883_s25 + $0x8] sm:$0xff]  ;;  %v228_v22 = vld [vmem:[%s883_s25 + $0x20] sm:$0xff] }
  0x1f   : > { %352 = vst [vmem:[%s889_s29 + $0xe0] sm:$0xff] %v222_v16  ;;  %353 = vst [vmem:[%s889_s29 + $0xf0] sm:$0xff] %v223_v17  ;;  %v229_v21 = vld [vmem:[%s883_s25 + $0x28] sm:$0xff]  ;;  %v231_v23 = vld [vmem:[%s883_s25 + $0x38] sm:$0xff] }
  0x20   : > { %v230_v24 = vld [vmem:[%s883_s25 + $0x30] sm:$0xff]  ;;  %v233_v25 = vld [vmem:[%s883_s25 + $0x48] sm:$0xff]  ;;  %v232_v26 = vld [vmem:[%s883_s25 + $0x40] sm:$0xff] }
  0x21   : > { %v235_v27 = vld [vmem:[%s883_s25 + $0x58] sm:$0xff]  ;;  %v234_v28 = vld [vmem:[%s883_s25 + $0x50] sm:$0xff]  ;;  %v237_v29 = vld [vmem:[%s883_s25 + $0x68] sm:$0xff] }
  0x22   : > { %246 = vperm.xlu0 %742, %v225_v20   ;;  %258 = vperm.xlu1 %743, %v229_v21   ;;  %v236_v30 = vld [vmem:[%s883_s25 + $0x60] sm:$0xff]  ;;  %v239_v31 = vld [vmem:[%s883_s25 + $0x78] sm:$0xff]  ;;  %v238_v32 = vld [vmem:[%s883_s25 + $0x70] sm:$0xff] }
  0x26   : > { %255 = vperm.xlu0 %742, %v228_v22   ;;  %264 = vperm.xlu1 %743, %v231_v23  }
  0x2a   : > { %261 = vperm.xlu0 %742, %v230_v24   ;;  %270 = vperm.xlu1 %743, %v233_v25  }
  0x2e   : > { %267 = vperm.xlu0 %742, %v232_v26   ;;  %276 = vperm.xlu1 %743, %v235_v27  }
  0x32   : > { %273 = vperm.xlu0 %742, %v234_v28   ;;  %282 = vperm.xlu1 %743, %v237_v29  }
  0x36   : > { %279 = vperm.xlu0 %742, %v236_v30   ;;  %288 = vperm.xlu1 %743, %v239_v31  }
  0x3a   : > { %285 = vperm.xlu0 %742, %v238_v32  }
  0x96   : > { %v250_v35 = vpop.permute.xlu1 %249 }
  0x97   : > { %vm292_vm1 = vcmp.eq.s32.totalorder %v922_v34, %v250_v35 }
  0x98   : > { %v614_v37 = vsel %vm292_vm1, 1.0, %v833_v36 }
  0x99   : > { %357 = vst.msk [vmem:[%s889_s29 + $0x28] sm:$0xff] %vm354_vm0, %v614_v37 }
  0x9d   : > { %v244_v38 = vpop.permute.xlu0 %243  ;;  %v253_v39 = vpop.permute.xlu1 %252 }
  0x9e   : > { %vm290_vm2 = vcmp.eq.s32.totalorder %v922_v34, %v244_v38  ;;  %vm293_vm3 = vcmp.eq.s32.totalorder %v922_v34, %v253_v39 }
  0x9f   : > { %v612_v40 = vsel %vm290_vm2, 1.0, %v833_v36  ;;  %v615_v41 = vsel %vm293_vm3, 1.0, %v833_v36 }
  0xa0   : > { %355 = vst.msk [vmem:[%s889_s29 + $0x8] sm:$0xff] %vm354_vm0, %v612_v40  ;;  %358 = vst.msk [vmem:[%s889_s29 + $0x38] sm:$0xff] %vm354_vm0, %v615_v41 }
  0xa1   : > { %v247_v42 = vpop.permute.xlu0 %246  ;;  %v259_v43 = vpop.permute.xlu1 %258 }
  0xa2   : > { %vm291_vm4 = vcmp.eq.s32.totalorder %v922_v34, %v247_v42  ;;  %vm295_vm5 = vcmp.eq.s32.totalorder %v922_v34, %v259_v43 }
  0xa3   : > { %v613_v44 = vsel %vm291_vm4, 1.0, %v833_v36  ;;  %v617_v45 = vsel %vm295_vm5, 1.0, %v833_v36 }
  0xa4   : > { %356 = vst.msk [vmem:[%s889_s29 + $0x18] sm:$0xff] %vm354_vm0, %v613_v44  ;;  %360 = vst.msk [vmem:[%s889_s29 + $0x58] sm:$0xff] %vm354_vm0, %v617_v45 }
  0xa5   : > { %v256_v46 = vpop.permute.xlu0 %255  ;;  %v265_v47 = vpop.permute.xlu1 %264 }
  0xa6   : > { %vm294_vm6 = vcmp.eq.s32.totalorder %v922_v34, %v256_v46  ;;  %vm297_vm7 = vcmp.eq.s32.totalorder %v922_v34, %v265_v47 }
  0xa7   : > { %v616_v48 = vsel %vm294_vm6, 1.0, %v833_v36  ;;  %v619_v49 = vsel %vm297_vm7, 1.0, %v833_v36 }
  0xa8   : > { %359 = vst.msk [vmem:[%s889_s29 + $0x48] sm:$0xff] %vm354_vm0, %v616_v48  ;;  %362 = vst.msk [vmem:[%s889_s29 + $0x78] sm:$0xff] %vm354_vm0, %v619_v49 }
  0xa9   : > { %v262_v50 = vpop.permute.xlu0 %261  ;;  %v271_v51 = vpop.permute.xlu1 %270 }
  0xaa   : > { %vm296_vm8 = vcmp.eq.s32.totalorder %v922_v34, %v262_v50  ;;  %vm299_vm9 = vcmp.eq.s32.totalorder %v922_v34, %v271_v51 }
  0xab   : > { %v618_v52 = vsel %vm296_vm8, 1.0, %v833_v36  ;;  %v621_v53 = vsel %vm299_vm9, 1.0, %v833_v36 }
  0xac   : > { %361 = vst.msk [vmem:[%s889_s29 + $0x68] sm:$0xff] %vm354_vm0, %v618_v52  ;;  %364 = vst.msk [vmem:[%s889_s29 + $0x98] sm:$0xff] %vm354_vm0, %v621_v53 }
  0xad   : > { %v268_v54 = vpop.permute.xlu0 %267  ;;  %v277_v55 = vpop.permute.xlu1 %276 }
  0xae   : > { %vm298_vm10 = vcmp.eq.s32.totalorder %v922_v34, %v268_v54  ;;  %vm301_vm11 = vcmp.eq.s32.totalorder %v922_v34, %v277_v55 }
  0xaf   : > { %v620_v56 = vsel %vm298_vm10, 1.0, %v833_v36  ;;  %v623_v57 = vsel %vm301_vm11, 1.0, %v833_v36 }
  0xb0   : > { %363 = vst.msk [vmem:[%s889_s29 + $0x88] sm:$0xff] %vm354_vm0, %v620_v56  ;;  %366 = vst.msk [vmem:[%s889_s29 + $0xb8] sm:$0xff] %vm354_vm0, %v623_v57 }
  0xb1   : > { %v274_v58 = vpop.permute.xlu0 %273  ;;  %v283_v59 = vpop.permute.xlu1 %282 }
  0xb2   : > { %vm300_vm12 = vcmp.eq.s32.totalorder %v922_v34, %v274_v58  ;;  %vm303_vm13 = vcmp.eq.s32.totalorder %v922_v34, %v283_v59 }
  0xb3   : > { %v622_v60 = vsel %vm300_vm12, 1.0, %v833_v36  ;;  %v625_v61 = vsel %vm303_vm13, 1.0, %v833_v36 }
  0xb4   : > { %365 = vst.msk [vmem:[%s889_s29 + $0xa8] sm:$0xff] %vm354_vm0, %v622_v60  ;;  %368 = vst.msk [vmem:[%s889_s29 + $0xd8] sm:$0xff] %vm354_vm0, %v625_v61 }
  0xb5   : > { %v280_v62 = vpop.permute.xlu0 %279  ;;  %v289_v63 = vpop.permute.xlu1 %288 }
  0xb6   : > { %vm302_vm14 = vcmp.eq.s32.totalorder %v922_v34, %v280_v62  ;;  %vm305_vm15 = vcmp.eq.s32.totalorder %v922_v34, %v289_v63  ;;  %377 = sbr.rel (!%p871_p4) target bundleno = 245 (0xf5), region = 32 }
  0xb7   : > { %v624_v0 = vsel %vm302_vm14, 1.0, %v833_v36  ;;  %v627_v1 = vsel %vm305_vm15, 1.0, %v833_v36 }
  0xb8   : > { %367 = vst.msk [vmem:[%s889_s29 + $0xc8] sm:$0xff] %vm354_vm0, %v624_v0  ;;  %370 = vst.msk [vmem:[%s889_s29 + $0xf8] sm:$0xff] %vm354_vm0, %v627_v1 }
  0xb9   : > { %v286_v2 = vpop.permute.xlu0 %285 }
  0xba   : > { %vm304_vm1 = vcmp.eq.s32.totalorder %v922_v34, %v286_v2 }
  0xbb   : > { %v626_v3 = vsel %vm304_vm1, 1.0, %v833_v36 }
  0xbc   : > { %369 = vst.msk [vmem:[%s889_s29 + $0xe8] sm:$0xff] %vm354_vm0, %v626_v3 }
  0xbd   : > { %s1128_s30 = smov (!%p380_p8, %s379_s30), 16 }
  0xbe   : > { %s647_s7 = sshll.u32 %s1128_s30, 8 }
  0xbf   : > { %p635_p9 = scmp.eq.s32.totalorder %s647_s7, 0 }
  0xc0   : > { %s985_s8 = sshrl.u32 (!%p635_p9), %s1128_s30, 4 }
  0xc1   : > { %390 = sbr.rel (%p635_p9) target bundleno = 245 (0xf5), region = 36  ;;  %p636_p10 = scmp.le.s32.totalorder (!%p635_p9), %s985_s8, 0 }
  0xc8   : > { %553 = sbr.rel (%p636_p10) target bundleno = 224 (0xe0), region = 87  ;;  %s1119_s9 = smov (!%p636_p10), %s979_s6 }
  0xc9   : > { %s1120_s11 = smov (!%p636_p10), %s889_s29  ;;  %s994_s12 = smov (!%p636_p10), 0  }
  0xca   : > { %s996_s14 = smov (!%p636_p10), 0  }
  0xcf LB: >> { %v403_v4 = vld [vmem:[%s806_s11] sm:$0xff]  ;;  %v405_v5 = vld [vmem:[%s806_s11 + $0x10] sm:$0xff]  ;;  %s467_s15 = sadd.s32 1, %s810_s12  ;;  %v435_v20 = vld [vmem:[%s806_s11 + $0x8] sm:$0xff]  ;;  %s397_s14 = sadd.s32 1, %s814_s14   ;;  %s814_s14 = sphi %s996_s14, %s397_s14   ;;  %s810_s12 = sphi %s994_s12, %s1123_s12   ;;  %s806_s11 = sphi %s1120_s11, %s1122_s11   ;;  %s802_s9 = sphi %s1119_s9, %s1121_s9  }
  0xd0   : >> { %v407_v6 = vld [vmem:[%s806_s11 + $0x20] sm:$0xff]  ;;  %404 = vst [vmem:[%s802_s9] sm:$0xff] %v403_v4  ;;  %406 = vst [vmem:[%s802_s9 + $0x10] sm:$0xff] %v405_v5  ;;  %v409_v7 = vld [vmem:[%s806_s11 + $0x30] sm:$0xff]  ;;  %p468_p11 = scmp.ge.s32.totalorder %s467_s15, %s985_s8  ;;  %p396_p12 = scmp.ge.s32.totalorder %s397_s14, %s985_s8 }
  0xd1   : >> { %408 = vst [vmem:[%s802_s9 + $0x20] sm:$0xff] %v407_v6  ;;  %v411_v8 = vld [vmem:[%s806_s11 + $0x40] sm:$0xff]  ;;  %v413_v9 = vld [vmem:[%s806_s11 + $0x50] sm:$0xff]  ;;  %410 = vst [vmem:[%s802_s9 + $0x30] sm:$0xff] %v409_v7 }
  0xd2   : >> { %412 = vst [vmem:[%s802_s9 + $0x40] sm:$0xff] %v411_v8  ;;  %414 = vst [vmem:[%s802_s9 + $0x50] sm:$0xff] %v413_v9  ;;  %v415_v10 = vld [vmem:[%s806_s11 + $0x60] sm:$0xff]  ;;  %v417_v11 = vld [vmem:[%s806_s11 + $0x70] sm:$0xff]  ;;  %s1130_s15 = smov (%p468_p11, %s467_s15), 0 }
  0xd3   : >> { %v419_v12 = vld [vmem:[%s806_s11 + $0x80] sm:$0xff]  ;;  %416 = vst [vmem:[%s802_s9 + $0x60] sm:$0xff] %v415_v10  ;;  %418 = vst [vmem:[%s802_s9 + $0x70] sm:$0xff] %v417_v11  ;;  %v421_v13 = vld [vmem:[%s806_s11 + $0x90] sm:$0xff]  ;;  %s637_s17 = sshll.u32 %s1130_s15, 8  ;;  %s1123_s12 = smov %s1130_s15 }
  0xd4   : >> { %420 = vst [vmem:[%s802_s9 + $0x80] sm:$0xff] %v419_v12  ;;  %v423_v14 = vld [vmem:[%s806_s11 + $0xa0] sm:$0xff]  ;;  %v425_v15 = vld [vmem:[%s806_s11 + $0xb0] sm:$0xff]  ;;  %422 = vst [vmem:[%s802_s9 + $0x90] sm:$0xff] %v421_v13  ;;  %s1052_s18 = scalar_lea.vmem %s889_s29, %s637_s17 [#allocation2]   ;;  %s473_s19 = scalar_lea.vmem %s979_s6, %s637_s17  }
  0xd5   : >> { %424 = vst [vmem:[%s802_s9 + $0xa0] sm:$0xff] %v423_v14  ;;  %426 = vst [vmem:[%s802_s9 + $0xb0] sm:$0xff] %v425_v15  ;;  %v427_v16 = vld [vmem:[%s806_s11 + $0xc0] sm:$0xff]  ;;  %v429_v17 = vld [vmem:[%s806_s11 + $0xd0] sm:$0xff] }
  0xd6   : >> { %v431_v18 = vld [vmem:[%s806_s11 + $0xe0] sm:$0xff]  ;;  %428 = vst [vmem:[%s802_s9 + $0xc0] sm:$0xff] %v427_v16  ;;  %430 = vst [vmem:[%s802_s9 + $0xd0] sm:$0xff] %v429_v17  ;;  %v433_v19 = vld [vmem:[%s806_s11 + $0xf0] sm:$0xff] }
  0xd7   : >> { %432 = vst [vmem:[%s802_s9 + $0xe0] sm:$0xff] %v431_v18  ;;  %v437_v21 = vld [vmem:[%s806_s11 + $0x18] sm:$0xff]  ;;  %434 = vst [vmem:[%s802_s9 + $0xf0] sm:$0xff] %v433_v19  ;;  %v439_v22 = vld [vmem:[%s806_s11 + $0x28] sm:$0xff] }
  0xd8   : >> { %436 = vst [vmem:[%s802_s9 + $0x8] sm:$0xff] %v435_v20  ;;  %438 = vst [vmem:[%s802_s9 + $0x18] sm:$0xff] %v437_v21  ;;  %v441_v23 = vld [vmem:[%s806_s11 + $0x38] sm:$0xff]  ;;  %v443_v24 = vld [vmem:[%s806_s11 + $0x48] sm:$0xff] }
  0xd9   : >> { %440 = vst [vmem:[%s802_s9 + $0x28] sm:$0xff] %v439_v22  ;;  %442 = vst [vmem:[%s802_s9 + $0x38] sm:$0xff] %v441_v23  ;;  %v445_v25 = vld [vmem:[%s806_s11 + $0x58] sm:$0xff]  ;;  %v447_v26 = vld [vmem:[%s806_s11 + $0x68] sm:$0xff]  ;;  %399 = sbr.rel (!%p396_p12) target bundleno = 207 (0xcf), region = 93 }
  0xda   : >> { %444 = vst [vmem:[%s802_s9 + $0x48] sm:$0xff] %v443_v24  ;;  %v449_v27 = vld [vmem:[%s806_s11 + $0x78] sm:$0xff]  ;;  %446 = vst [vmem:[%s802_s9 + $0x58] sm:$0xff] %v445_v25  ;;  %v451_v28 = vld [vmem:[%s806_s11 + $0x88] sm:$0xff] }
  0xdb   : >> { %448 = vst [vmem:[%s802_s9 + $0x68] sm:$0xff] %v447_v26  ;;  %450 = vst [vmem:[%s802_s9 + $0x78] sm:$0xff] %v449_v27  ;;  %v453_v29 = vld [vmem:[%s806_s11 + $0x98] sm:$0xff]  ;;  %v455_v30 = vld [vmem:[%s806_s11 + $0xa8] sm:$0xff] }
  0xdc   : >> { %452 = vst [vmem:[%s802_s9 + $0x88] sm:$0xff] %v451_v28  ;;  %454 = vst [vmem:[%s802_s9 + $0x98] sm:$0xff] %v453_v29  ;;  %v457_v31 = vld [vmem:[%s806_s11 + $0xb8] sm:$0xff]  ;;  %v459_v32 = vld [vmem:[%s806_s11 + $0xc8] sm:$0xff] }
  0xdd   : >> { %456 = vst [vmem:[%s802_s9 + $0xa8] sm:$0xff] %v455_v30  ;;  %v461_v33 = vld [vmem:[%s806_s11 + $0xd8] sm:$0xff]  ;;  %458 = vst [vmem:[%s802_s9 + $0xb8] sm:$0xff] %v457_v31  ;;  %v463_v34 = vld [vmem:[%s806_s11 + $0xe8] sm:$0xff] }
  0xde   : >> { %460 = vst [vmem:[%s802_s9 + $0xc8] sm:$0xff] %v459_v32  ;;  %462 = vst [vmem:[%s802_s9 + $0xd8] sm:$0xff] %v461_v33  ;;  %v465_v35 = vld [vmem:[%s806_s11 + $0xf8] sm:$0xff]  ;;  %s1122_s11 = smov %s1052_s18 }
  0xdf   : >> { %464 = vst [vmem:[%s802_s9 + $0xe8] sm:$0xff] %v463_v34  ;;  %466 = vst [vmem:[%s802_s9 + $0xf8] sm:$0xff] %v465_v35  ;;  %s1121_s9 = smov %s473_s19 }
  0xe0 PF: > { %s1093_s20 = sand.u32 15, %s1128_s30   ;;  %s650_s21 = sshll.u32 %s985_s8, 8 }
  0xe1   : > { %s1097_s22 = scalar_lea.vmem %s889_s29, %s650_s21 [#allocation2]   ;;  %s480_s23 = scalar_lea.vmem %s979_s6, %s650_s21  }
  0xe2   : > { %p642_p13 = scmp.le.s32.totalorder %s1093_s20, 0 }
  0xe3   : > { %s816_s24 = smov (!%p642_p13), %s480_s23   ;;  %s820_s25 = smov (!%p642_p13), %s1097_s22  }
  0xe4   : > { %567 = sbr.rel (%p642_p13) target bundleno = 245 (0xf5), region = 98  ;;  %s824_s26 = smov (!%p642_p13), 0  }
  0xe5   : > { %s828_s27 = smov (!%p642_p13), 0  }
  0xeb LB: >> { %v490_v36 = vld [vmem:[%s822_s25] sm:$0xff]  ;;  %v492_v37 = vld [vmem:[%s822_s25 + $0x8] sm:$0xff]  ;;  %s494_s28 = sadd.s32 1, %s826_s26  ;;  %s484_s27 = sadd.s32 1, %s830_s27   ;;  %s830_s27 = sphi %s828_s27, %s484_s27   ;;  %s826_s26 = sphi %s824_s26, %s825_s26   ;;  %s822_s25 = sphi %s820_s25, %s499_s25   ;;  %s818_s24 = sphi %s816_s24, %s500_s24  }
  0xec   : >> { %491 = vst [vmem:[%s818_s24] sm:$0xff] %v490_v36  ;;  %493 = vst [vmem:[%s818_s24 + $0x8] sm:$0xff] %v492_v37  ;;  %p495_p0 = scmp.ge.s32.totalorder %s494_s28, %s1093_s20  ;;  %p483_p1 = scmp.ge.s32.totalorder %s484_s27, %s1093_s20 }
  0xee   : >> { %s1132_s28 = smov (%p495_p0, %s494_s28), 0  ;;  %486 = sbr.rel (!%p483_p1) target bundleno = 235 (0xeb), region = 104 }
  0xef   : >> { %s643_s29 = sshll.u32 %s1132_s28, 4  ;;  %s825_s26 = smov %s1132_s28  }
  0xf0   : >> { %s499_s25 = scalar_lea.vmem %s1097_s22, %s643_s29 [#allocation2]   ;;  %s500_s24 = scalar_lea.vmem %s480_s23, %s643_s29  }
  0xf5 PF: > { %p9_p2 = scmp.ge.s32.totalorder %s862_s13, 5   ;;  %s1124_s9 = smov %s794_s10 }
  0xf6   : > { %s1125_s10 = smov %s869_s16  ;;  %s1126_s11 = smov %s862_s13 }
  0xf7   :  { %11 = sbr.rel (!%p9_p2) target bundleno = 2 (0x2), region = 115 }

</bundles_post_ra>
